<compile_context>
chip_gen: v6e
topology: v6e:2x2x1
jax: 0.10.0
libtpu: 0.0.40
codegen_flags: <defaults>
</compile_context>

<pallas_src>
import functools

import jax
import jax.numpy as jnp
from jax.experimental import pallas as pl
from jax.experimental.pallas import tpu as pltpu

EPS = 1e-5  # nn.LayerNorm default

_ACTIVATIONS = {
    "relu": lambda y: jnp.maximum(y, 0.0),
    "tanh": jnp.tanh,
    "leaky_relu": lambda y: jnp.where(y >= 0, y, 0.01 * y),   # nn.LeakyReLU default slope
    "elu": lambda y: jnp.where(y >= 0, y, jnp.expm1(y)),      # nn.ELU alpha=1
}


def _round_up(x, m):
    return ((x + m - 1) // m) * m


def _make_fused_mlp_kernel(num_hidden, activation, mm_dtype):
    act = _ACTIVATIONS.get(activation, _ACTIVATIONS["relu"])

    def kernel(*refs):
        # refs = (x, [w, packed_affine] * num_hidden, packed_final, out)
        x_ref, out_ref = refs[0], refs[-1]

        h = x_ref[...]                                  # (TB, D_in) f32
        idx = 1
        for _ in range(num_hidden):
            w = refs[idx][...]                          # (D_prev, H)  bf16 (MXU-native)
            vec = refs[idx + 1]                         # (8, H) f32: rows 0=b, 1=gamma, 2=beta
            idx += 2

            # Linear on the MXU: bf16 operands, explicit f32 accumulation.
            y = jnp.dot(h.astype(w.dtype), w, preferred_element_type=jnp.float32)
            y = y + vec[0:1, :]

            # One-pass LayerNorm statistics (independent reductions, overlap on XLU).
            inv_n = 1.0 / y.shape[-1]
            s1 = jnp.sum(y, axis=-1, keepdims=True)
            s2 = jnp.sum(y * y, axis=-1, keepdims=True)
            mean = s1 * inv_n
            var = jnp.maximum(s2 * inv_n - mean * mean, 0.0)   # guard vs cancellation
            y = (y - mean) * jax.lax.rsqrt(var + EPS) * vec[1:2, :] + vec[2:3, :]

            h = act(y)
            # nn.Dropout -> identity (inference).

        fin = refs[idx]                                 # (8, H_last) f32: row0=w_out, row1=b_out
        # Final Linear(., 1), computed transposed so the output is lane-dense:
        # (1, H) x (TB, H)^T -> (1, TB) on the MXU (one cheap M=1 matmul) instead of
        # producing a lane-sparse (TB, 1) column that needs masked vst.msk stores.
        row = jax.lax.dot_general(
            fin[0:1, :].astype(mm_dtype), h.astype(mm_dtype),
            dimension_numbers=(((1,), (1,)), ((), ())),
            preferred_element_type=jnp.float32)         # (1, TB)
        row = row + fin[1:2, 0:1]                       # + output bias
        out_ref[...] = row.reshape(1, 1, row.shape[-1])

    return kernel


def _fused_vmem_bytes(tb, d_in, widths, weight_itemsize):
    """Bytes resident in VMEM for the fused kernel at batch-tile size `tb`."""
    weight_bytes = 0
    prev = d_in
    for h in widths:
        weight_bytes += prev * h * weight_itemsize      # W, single-buffered
        weight_bytes += 8 * h * 4                       # packed (b, gamma, beta)
        prev = h
    weight_bytes += 8 * prev * 4                        # packed final (w_out, b_out)
    io_bytes = 2 * tb * d_in * 4 + 2 * tb * 4           # double-buffered x tile + out row
    act_bytes = 4 * tb * max(widths + [d_in]) * 4       # live activations / temporaries
    return weight_bytes + io_bytes + act_bytes


def _pick_tb(batch, tb):
    """Batch tile: 256-row tiles for the v6e/v7x 256x256 MXU when the batch is
    large; otherwise aim for >= 4 grid steps (>= 2 per TensorCore on v7x)."""
    if tb is None:
        tb = 256 if batch >= 1024 else max(8, _round_up(pl.cdiv(batch, 4), 8))
    tb = min(int(tb), batch)
    if tb != batch:
        tb = max(8, (tb // 8) * 8)                      # sublane-aligned
    return tb


def mlp_forward(x, params, *, tb=None, activation="relu"):
    """Fused forward.

    params = {"hidden": ((w[in, out] bf16, packed[8, out] f32), ...),
              "final": packed[8, last] f32 (row 0 = w_out, row 1 = b_out)}
    """
    B, D = x.shape
    hidden = params["hidden"]
    fin = params["final"]
    widths = [int(w.shape[1]) for (w, _) in hidden]
    mm_dtype = hidden[0][0].dtype if hidden else jnp.float32
    w_itemsize = jnp.dtype(mm_dtype).itemsize

    tb = _pick_tb(B, tb)
    # v5e's scoped-VMEM default is only 16 MiB and v7x has 64 MiB physical VMEM:
    # shrink the batch tile until the fused working set fits, then raise the
    # scoped limit explicitly to exactly what we need (plus headroom).
    while tb > 8 and _fused_vmem_bytes(tb, D, widths, w_itemsize) > (48 << 20):
        tb = max(8, (tb // 2 // 8) * 8)
    vmem_limit = int(min(max(_fused_vmem_bytes(tb, D, widths, w_itemsize) + (2 << 20),
                             8 << 20), 64 << 20))
    num_tiles = pl.cdiv(B, tb)

    # Constant index_map -> single-buffered, VMEM-resident parameter blocks
    # (no double-buffering of data that never changes across grid steps).
    resident = functools.partial(pl.BlockSpec, index_map=lambda i: (0, 0),
                                 pipeline_mode=pl.Buffered(1))

    args = [x]
    in_specs = [pl.BlockSpec((tb, D), lambda i: (i, 0))]
    for (w, vec) in hidden:
        args += [w, vec]
        in_specs += [resident(w.shape), resident(vec.shape)]
    args.append(fin)
    in_specs.append(resident(fin.shape))

    kernel = _make_fused_mlp_kernel(len(hidden), activation, mm_dtype)

    out = pl.pallas_call(
        kernel,
        out_shape=jax.ShapeDtypeStruct((num_tiles, 1, tb), jnp.float32),
        grid=(num_tiles,),
        in_specs=in_specs,
        out_specs=pl.BlockSpec((1, 1, tb), lambda i: (i, 0, 0)),
        compiler_params=pltpu.CompilerParams(
            dimension_semantics=("parallel",),   # batch tiles shard across TCs (megacore)
            vmem_limit_bytes=vmem_limit,
        ),
    )(*args)
    # Lane-dense (num_tiles, 1, tb) -> (B, 1).  Rows past B (ragged last tile) may
    # hold values computed from padded input rows; they are sliced away here and
    # never influence valid rows (everything in the kernel is row-wise).
    return out.reshape(-1)[:B].reshape(B, 1)


def init_params(key, input_dim, hidden_layers, *, param_dtype=jnp.bfloat16,
                random_affine=False):
    """Match the PyTorch module init: xavier_normal_ Linear weights, zero Linear
    bias, LayerNorm gamma=1 / beta=0.  Weights are stored [in, out] in
    `param_dtype` (bf16: MXU-native); bias/gamma/beta are packed as rows 0..2 of
    an (8, H) f32 block.  `random_affine=True` perturbs the affine rows so the
    packed path is numerically exercised in tests."""
    hidden = []
    prev = int(input_dim)
    for hsz in hidden_layers:
        hsz = int(hsz)
        key, wk, ak = jax.random.split(key, 3)
        std = (2.0 / (prev + hsz)) ** 0.5                               # xavier_normal_
        w = (std * jax.random.normal(wk, (prev, hsz), jnp.float32)).astype(param_dtype)
        vec = jnp.zeros((8, hsz), jnp.float32).at[1, :].set(1.0)        # gamma = 1
        if random_affine:
            vec = vec.at[0:3, :].add(0.1 * jax.random.normal(ak, (3, hsz), jnp.float32))
        hidden.append((w, vec))
        prev = hsz
    key, wk, ak = jax.random.split(key, 3)
    std = (2.0 / (prev + 1)) ** 0.5
    w_out = std * jax.random.normal(wk, (prev,), jnp.float32)
    fin = jnp.zeros((8, prev), jnp.float32).at[0, :].set(w_out)
    if random_affine:
        fin = fin.at[1, :].set(0.1 * jax.random.normal(ak, (), jnp.float32))
    return {"hidden": tuple(hidden), "final": fin}


def reference_forward(x, params, activation="relu"):
    """Pure-JAX reference with the SAME explicit precision policy as the kernel
    (bf16 matmul operands, f32 accumulation) so the comparison is meaningful."""
    act = _ACTIVATIONS.get(activation, _ACTIVATIONS["relu"])
    hidden = params["hidden"]
    fin = params["final"]
    mm_dtype = hidden[0][0].dtype if hidden else jnp.float32
    h = x.astype(jnp.float32)
    for (w, vec) in hidden:
        y = jnp.dot(h.astype(w.dtype), w, preferred_element_type=jnp.float32) + vec[0:1, :]
        m = jnp.mean(y, axis=-1, keepdims=True)
        v = jnp.mean((y - m) ** 2, axis=-1, keepdims=True)
        y = (y - m) * jax.lax.rsqrt(v + EPS) * vec[1:2, :] + vec[2:3, :]
        h = act(y)
    row = jax.lax.dot_general(fin[0:1, :].astype(mm_dtype), h.astype(mm_dtype),
                              dimension_numbers=(((1,), (1,)), ((), ())),
                              preferred_element_type=jnp.float32)       # (1, B)
    return row.reshape(-1, 1) + fin[1, 0]


if __name__ == "__main__":
    key = jax.random.PRNGKey(0)

    batch, input_dim = 64, 16
    hidden_layers = [128, 64]        # small, lane-friendly hidden widths

    kx, kp = jax.random.split(key)
    x = jax.random.normal(kx, (batch, input_dim), dtype=jnp.float32)
    # random_affine=True -> non-trivial bias/gamma/beta so the packed-affine path
    # is actually exercised (the PyTorch init sets them to 0 / 1 / 0).
    params = init_params(kp, input_dim, hidden_layers, random_affine=True)

    forward = jax.jit(functools.partial(mlp_forward, activation="relu"))
    y = forward(x, params)           # default tb heuristic -> tb=16, grid=(4,)
    jax.block_until_ready(y)

    ref = reference_forward(x, params, activation="relu")
    assert y.shape == (batch, 1)
    max_err = float(jnp.max(jnp.abs(y - ref)))
    assert jnp.allclose(y, ref, atol=2e-3, rtol=2e-3), max_err
    print("KERNEL_OK")
</pallas_src>

<mosaic_0001>
module attributes {stable_mosaic.version = 11 : i64} {
  func.func @kernel(%arg0: i32, %arg1: memref<16x16xf32, #tpu.memory_space<vmem>>, %arg2: memref<16x128xbf16, #tpu.memory_space<vmem>>, %arg3: memref<8x128xf32, #tpu.memory_space<vmem>>, %arg4: memref<128x64xbf16, #tpu.memory_space<vmem>>, %arg5: memref<8x64xf32, #tpu.memory_space<vmem>>, %arg6: memref<8x64xf32, #tpu.memory_space<vmem>>, %arg7: memref<1x1x16xf32, #tpu.memory_space<vmem>>) attributes {dimension_semantics = [#tpu.dimension_semantics<parallel>], iteration_bounds = array<i64: 4>, scalar_prefetch = 0 : i64, scratch_operands = 0 : i64, tpu.core_type = #tpu.core_type<tc>, window_params = [{transform_indices = @transform_0, window_bounds = array<i64: 16, 16>}, {pipeline_mode = #tpu.pipeline_mode<synchronous>, transform_indices = @transform_1, window_bounds = array<i64: 16, 128>}, {pipeline_mode = #tpu.pipeline_mode<synchronous>, transform_indices = @transform_2, window_bounds = array<i64: 8, 128>}, {pipeline_mode = #tpu.pipeline_mode<synchronous>, transform_indices = @transform_3, window_bounds = array<i64: 128, 64>}, {pipeline_mode = #tpu.pipeline_mode<synchronous>, transform_indices = @transform_4, window_bounds = array<i64: 8, 64>}, {pipeline_mode = #tpu.pipeline_mode<synchronous>, transform_indices = @transform_5, window_bounds = array<i64: 8, 64>}, {transform_indices = @transform_6, window_bounds = array<i64: 1, 1, 16>}]} {
    %c0 = arith.constant 0 : index
    %c0_0 = arith.constant 0 : index
    %0 = vector.load %arg1[%c0, %c0_0] : memref<16x16xf32, #tpu.memory_space<vmem>>, vector<16x16xf32>
    %c0_1 = arith.constant 0 : index
    %c0_2 = arith.constant 0 : index
    %1 = vector.load %arg2[%c0_1, %c0_2] : memref<16x128xbf16, #tpu.memory_space<vmem>>, vector<16x128xbf16>
    %2 = arith.truncf %0 : vector<16x16xf32> to vector<16x16xbf16>
    %cst = arith.constant dense<0.000000e+00> : vector<16x128xf32>
    %3 = tpu.matmul %2, %1, %cst {dimension_numbers = #tpu.dot_dimension_numbers<[1], [0], [0], [1], [0, 0, 1, 1], [], []>} : vector<16x16xbf16>, vector<16x128xbf16>, vector<16x128xf32> -> vector<16x128xf32>
    %c0_3 = arith.constant 0 : index
    %c0_4 = arith.constant 0 : index
    %4 = vector.load %arg3[%c0_3, %c0_4] : memref<8x128xf32, #tpu.memory_space<vmem>>, vector<1x128xf32>
    %5 = vector.broadcast %4 : vector<1x128xf32> to vector<16x128xf32>
    %6 = arith.addf %3, %5 : vector<16x128xf32>
    %cst_5 = arith.constant dense<0.000000e+00> : vector<16xf32>
    %7 = vector.multi_reduction <add>, %6, %cst_5 [1] : vector<16x128xf32> to vector<16xf32>
    %8 = vector.shape_cast %7 : vector<16xf32> to vector<16x1xf32>
    %9 = arith.mulf %6, %6 : vector<16x128xf32>
    %cst_6 = arith.constant dense<0.000000e+00> : vector<16xf32>
    %10 = vector.multi_reduction <add>, %9, %cst_6 [1] : vector<16x128xf32> to vector<16xf32>
    %11 = vector.shape_cast %10 : vector<16xf32> to vector<16x1xf32>
    %cst_7 = arith.constant 7.812500e-03 : f32
    %12 = vector.broadcast %cst_7 : f32 to vector<16x1xf32>
    %13 = arith.mulf %8, %12 : vector<16x1xf32>
    %cst_8 = arith.constant 7.812500e-03 : f32
    %14 = vector.broadcast %cst_8 : f32 to vector<16x1xf32>
    %15 = arith.mulf %11, %14 : vector<16x1xf32>
    %16 = arith.mulf %13, %13 : vector<16x1xf32>
    %17 = arith.subf %15, %16 : vector<16x1xf32>
    %cst_9 = arith.constant 0.000000e+00 : f32
    %18 = vector.broadcast %cst_9 : f32 to vector<16x1xf32>
    %19 = arith.maximumf %17, %18 : vector<16x1xf32>
    %20 = vector.broadcast %13 : vector<16x1xf32> to vector<16x128xf32>
    %21 = arith.subf %6, %20 : vector<16x128xf32>
    %cst_10 = arith.constant 9.99999974E-6 : f32
    %22 = vector.broadcast %cst_10 : f32 to vector<16x1xf32>
    %23 = arith.addf %19, %22 : vector<16x1xf32>
    %24 = math.rsqrt %23 : vector<16x1xf32>
    %25 = vector.broadcast %24 : vector<16x1xf32> to vector<16x128xf32>
    %26 = arith.mulf %21, %25 : vector<16x128xf32>
    %c1 = arith.constant 1 : index
    %c0_11 = arith.constant 0 : index
    %27 = vector.load %arg3[%c1, %c0_11] : memref<8x128xf32, #tpu.memory_space<vmem>>, vector<1x128xf32>
    %28 = vector.broadcast %27 : vector<1x128xf32> to vector<16x128xf32>
    %29 = arith.mulf %26, %28 : vector<16x128xf32>
    %c2 = arith.constant 2 : index
    %c0_12 = arith.constant 0 : index
    %30 = vector.load %arg3[%c2, %c0_12] : memref<8x128xf32, #tpu.memory_space<vmem>>, vector<1x128xf32>
    %31 = vector.broadcast %30 : vector<1x128xf32> to vector<16x128xf32>
    %32 = arith.addf %29, %31 : vector<16x128xf32>
    %cst_13 = arith.constant 0.000000e+00 : f32
    %33 = vector.broadcast %cst_13 : f32 to vector<16x128xf32>
    %34 = arith.maximumf %32, %33 : vector<16x128xf32>
    %c0_14 = arith.constant 0 : index
    %c0_15 = arith.constant 0 : index
    %35 = vector.load %arg4[%c0_14, %c0_15] : memref<128x64xbf16, #tpu.memory_space<vmem>>, vector<128x64xbf16>
    %36 = arith.truncf %34 : vector<16x128xf32> to vector<16x128xbf16>
    %cst_16 = arith.constant dense<0.000000e+00> : vector<16x64xf32>
    %37 = tpu.matmul %36, %35, %cst_16 {dimension_numbers = #tpu.dot_dimension_numbers<[1], [0], [0], [1], [0, 0, 1, 1], [], []>} : vector<16x128xbf16>, vector<128x64xbf16>, vector<16x64xf32> -> vector<16x64xf32>
    %c0_17 = arith.constant 0 : index
    %c0_18 = arith.constant 0 : index
    %38 = vector.load %arg5[%c0_17, %c0_18] : memref<8x64xf32, #tpu.memory_space<vmem>>, vector<1x64xf32>
    %39 = vector.broadcast %38 : vector<1x64xf32> to vector<16x64xf32>
    %40 = arith.addf %37, %39 : vector<16x64xf32>
    %cst_19 = arith.constant dense<0.000000e+00> : vector<16xf32>
    %41 = vector.multi_reduction <add>, %40, %cst_19 [1] : vector<16x64xf32> to vector<16xf32>
    %42 = vector.shape_cast %41 : vector<16xf32> to vector<16x1xf32>
    %43 = arith.mulf %40, %40 : vector<16x64xf32>
    %cst_20 = arith.constant dense<0.000000e+00> : vector<16xf32>
    %44 = vector.multi_reduction <add>, %43, %cst_20 [1] : vector<16x64xf32> to vector<16xf32>
    %45 = vector.shape_cast %44 : vector<16xf32> to vector<16x1xf32>
    %cst_21 = arith.constant 1.562500e-02 : f32
    %46 = vector.broadcast %cst_21 : f32 to vector<16x1xf32>
    %47 = arith.mulf %42, %46 : vector<16x1xf32>
    %cst_22 = arith.constant 1.562500e-02 : f32
    %48 = vector.broadcast %cst_22 : f32 to vector<16x1xf32>
    %49 = arith.mulf %45, %48 : vector<16x1xf32>
    %50 = arith.mulf %47, %47 : vector<16x1xf32>
    %51 = arith.subf %49, %50 : vector<16x1xf32>
    %cst_23 = arith.constant 0.000000e+00 : f32
    %52 = vector.broadcast %cst_23 : f32 to vector<16x1xf32>
    %53 = arith.maximumf %51, %52 : vector<16x1xf32>
    %54 = vector.broadcast %47 : vector<16x1xf32> to vector<16x64xf32>
    %55 = arith.subf %40, %54 : vector<16x64xf32>
    %cst_24 = arith.constant 9.99999974E-6 : f32
    %56 = vector.broadcast %cst_24 : f32 to vector<16x1xf32>
    %57 = arith.addf %53, %56 : vector<16x1xf32>
    %58 = math.rsqrt %57 : vector<16x1xf32>
    %59 = vector.broadcast %58 : vector<16x1xf32> to vector<16x64xf32>
    %60 = arith.mulf %55, %59 : vector<16x64xf32>
    %c1_25 = arith.constant 1 : index
    %c0_26 = arith.constant 0 : index
    %61 = vector.load %arg5[%c1_25, %c0_26] : memref<8x64xf32, #tpu.memory_space<vmem>>, vector<1x64xf32>
    %62 = vector.broadcast %61 : vector<1x64xf32> to vector<16x64xf32>
    %63 = arith.mulf %60, %62 : vector<16x64xf32>
    %c2_27 = arith.constant 2 : index
    %c0_28 = arith.constant 0 : index
    %64 = vector.load %arg5[%c2_27, %c0_28] : memref<8x64xf32, #tpu.memory_space<vmem>>, vector<1x64xf32>
    %65 = vector.broadcast %64 : vector<1x64xf32> to vector<16x64xf32>
    %66 = arith.addf %63, %65 : vector<16x64xf32>
    %cst_29 = arith.constant 0.000000e+00 : f32
    %67 = vector.broadcast %cst_29 : f32 to vector<16x64xf32>
    %68 = arith.maximumf %66, %67 : vector<16x64xf32>
    %c0_30 = arith.constant 0 : index
    %c0_31 = arith.constant 0 : index
    %69 = vector.load %arg6[%c0_30, %c0_31] : memref<8x64xf32, #tpu.memory_space<vmem>>, vector<1x64xf32>
    %70 = arith.truncf %69 : vector<1x64xf32> to vector<1x64xbf16>
    %71 = arith.truncf %68 : vector<16x64xf32> to vector<16x64xbf16>
    %cst_32 = arith.constant dense<0.000000e+00> : vector<1x16xf32>
    %72 = tpu.matmul %70, %71, %cst_32 {dimension_numbers = #tpu.dot_dimension_numbers<[1], [1], [0], [0], [0, 0, 1, 0], [], []>} : vector<1x64xbf16>, vector<16x64xbf16>, vector<1x16xf32> -> vector<1x16xf32>
    %c1_33 = arith.constant 1 : index
    %c0_34 = arith.constant 0 : index
    %73 = vector.load %arg6[%c1_33, %c0_34] : memref<8x64xf32, #tpu.memory_space<vmem>>, vector<1x1xf32>
    %74 = vector.broadcast %73 : vector<1x1xf32> to vector<1x16xf32>
    %75 = arith.addf %72, %74 : vector<1x16xf32>
    %76 = vector.shape_cast %75 : vector<1x16xf32> to vector<1x1x16xf32>
    %c0_35 = arith.constant 0 : index
    %c0_36 = arith.constant 0 : index
    %c0_37 = arith.constant 0 : index
    %77 = vector.load %arg7[%c0_35, %c0_36, %c0_37] : memref<1x1x16xf32, #tpu.memory_space<vmem>>, vector<1x1x16xf32>
    tpu.vector_store %arg7[%c0_35, %c0_36, %c0_37], %76 {strides = array<i32>} : memref<1x1x16xf32, #tpu.memory_space<vmem>>, vector<1x1x16xf32>,
    return
  }
  func.func @transform_0(%arg0: i32) -> (i32, i32) {
    %c0_i32 = arith.constant 0 : i32
    %c0_i32_0 = arith.constant 0 : i32
    return %arg0, %c0_i32 : i32, i32
  }
  func.func @transform_1(%arg0: i32) -> (i32, i32) {
    %c0_i32 = arith.constant 0 : i32
    %c0_i32_0 = arith.constant 0 : i32
    %c0_i32_1 = arith.constant 0 : i32
    return %c0_i32, %c0_i32_0 : i32, i32
  }
  func.func @transform_2(%arg0: i32) -> (i32, i32) {
    %c0_i32 = arith.constant 0 : i32
    %c0_i32_0 = arith.constant 0 : i32
    %c0_i32_1 = arith.constant 0 : i32
    return %c0_i32, %c0_i32_0 : i32, i32
  }
  func.func @transform_3(%arg0: i32) -> (i32, i32) {
    %c0_i32 = arith.constant 0 : i32
    %c0_i32_0 = arith.constant 0 : i32
    %c0_i32_1 = arith.constant 0 : i32
    return %c0_i32, %c0_i32_0 : i32, i32
  }
  func.func @transform_4(%arg0: i32) -> (i32, i32) {
    %c0_i32 = arith.constant 0 : i32
    %c0_i32_0 = arith.constant 0 : i32
    %c0_i32_1 = arith.constant 0 : i32
    return %c0_i32, %c0_i32_0 : i32, i32
  }
  func.func @transform_5(%arg0: i32) -> (i32, i32) {
    %c0_i32 = arith.constant 0 : i32
    %c0_i32_0 = arith.constant 0 : i32
    %c0_i32_1 = arith.constant 0 : i32
    return %c0_i32, %c0_i32_0 : i32, i32
  }
  func.func @transform_6(%arg0: i32) -> (i32, i32, i32) {
    %c0_i32 = arith.constant 0 : i32
    %c0_i32_0 = arith.constant 0 : i32
    %c0_i32_1 = arith.constant 0 : i32
    return %arg0, %c0_i32, %c0_i32_0 : i32, i32, i32
  }
}

</mosaic_0001>

<bundles_post_ra>
// kernel: mlp_forward.1
= control target key start
LH: loop header
LB: loop body
LE: loop exit
PB: predicated region body
PF: predicated region fallthrough
CT: control target
= control target key end

     0   :  { %s766_s21 = smov 0   ;;  %s845_s0 = inlined_call_operand.vmem [shape: f32[64,16], index: 0, kind: input, shape index: {}]   ;;  %s846_s1 = inlined_call_operand.vmem [shape: bf16[16,128], index: 1, kind: input, shape index: {}]   ;;  %s847_s2 = inlined_call_operand.vmem [shape: f32[8,128], index: 2, kind: input, shape index: {}]   ;;  %s848_s3 = inlined_call_operand.vmem [shape: bf16[128,64], index: 3, kind: input, shape index: {}]   ;;  %s849_s4 = inlined_call_operand.vmem [shape: f32[8,64], index: 4, kind: input, shape index: {}]   ;;  %s850_s5 = inlined_call_operand.vmem [shape: f32[8,64], index: 5, kind: input, shape index: {}]   ;;  %s851_s6 = inlined_call_operand.vmem [shape: f32[4,1,16], index: 6, kind: output, shape index: {}]  }
   0x1 LB: > { %s772_s22 = sadd.s32 4294967295, %s726_s21   ;;  %p624_p0 = scmp.ge.s32.totalorder %s726_s21, 1  ;;  %s726_s21 = sphi %s766_s21, %s16_s21  }
   0x2   : > { %p213_p1 = scmp.lt.s32.totalorder %s726_s21, 5 }
   0x4   : > { %p214_p2 = pnand %p624_p0, %p213_p1 }
   0x5   : > { %s625_s25 = sshll.u32 (!%p214_p2), %s772_s22, 1  ;;  %p247_p4 = scmp.lt.s32.totalorder (!%p214_p2), %s772_s22, 3 }
   0x6   : > { %217 = sbr.rel (%p214_p2) target bundleno = 969 (0x3c9), region = 44  ;;  %p242_p3 = scmp.lt.s32.totalorder (!%p214_p2), %s625_s25, 7 }
   0xb   : > { %v703_v0 = vld [vmem:[%s846_s1] sm:$0xff]   ;;  %v728_v1 = vmov 0.0   ;;  %vm729_vm0 = vmmov 0   ;;  %s853_s25 = smov (!%p242_p3, %s625_s25), 7  ;;  %vm267_vm1 = vcmask 130048   ;;  %v704_v14 = vld [vmem:[%s848_s3 + $0x38] sm:$0xff]  }
   0xc   : > { %659 = vmatprep.subr.bf16.mxu0 %v728_v1  ;;  %665 = vmatprep.subr.bf16.mxu1 %v728_v1  ;;  %s626_s26 = sshll.u32 %s853_s25, 3  ;;  %v627_v5 = vld [vmem:[%s847_s2] ss:$0 sm:$0xff]  ;;  %v705_v15 = vld [vmem:[%s848_s3 + $0x30] sm:$0xff]   ;;  %v706_v16 = vld [vmem:[%s848_s3 + $0x28] sm:$0xff]   ;;  %vm467_vm2 = vcmask 523264  }
   0xd   : > { %660 = vmatpush3.bf16.msra.mxu0 %v703_v0  ;;  %661 = vmatprep.mubr.msk.bf16.mxu0 %vm729_vm0, %v728_v1  ;;  %s245_s29 = scalar_lea.vmem %s845_s0, %s626_s26  ;;  %v707_v17 = vld [vmem:[%s848_s3 + $0x20] sm:$0xff]   ;;  %v708_v18 = vld [vmem:[%s848_s3 + $0x18] sm:$0xff]   ;;  %v709_v19 = vld [vmem:[%s848_s3 + $0x10] sm:$0xff]   ;;  %s855_s22 = smov (!%p247_p4, %s772_s22), 3  ;;  %vm571_vm3 = vcmask 122880  }
   0xe   : > { %681 = vmatprep.mubr.msk.bf16.mxu1 %vm729_vm0, %v728_v1  ;;  %685 = vmatprep.subr.bf16.mxu0 %v728_v1  ;;  %v251_v2 = vld [vmem:[%s245_s29] sm:$0xff]  ;;  %v252_v3 = vld [vmem:[%s245_s29 + $0x8] sm:$0xff]  ;;  %s249_s18 = scalar_lea.vmem %s851_s6, %s855_s22 }
   0xf   : > { %v255_v4 = vpack.c.bf16 %v252_v3, %v251_v2  ;;  %666 = vmatpush3.bf16.msra.mxu1 %v704_v14  ;;  %v710_v20 = vld [vmem:[%s848_s3 + $0x8] sm:$0xff]   ;;  %v711_v21 = vld [vmem:[%s848_s3] sm:$0xff]   ;;  %v730_v3 = vmov 0  }
  0x10   : > { %667 = vmatprep.subr.bf16.mxu1 %v728_v1  ;;  %v630_v40 = vld [vmem:[%s847_s2 + $0x1] ss:$0 sm:$0xff]  ;;  %v631_v45 = vld [vmem:[%s847_s2 + $0x2] ss:$0 sm:$0xff]  ;;  %v632_v53 = vld [vmem:[%s849_s4] ss:$0 sm:$0xff]  ;;  %702 = vset.pattern.permute.xlu0 %v730_v3 }
  0x11   : > { %662 = vmatmul.mubr.msk.bf16.vlgmr.msra.gmra.mxu0 %vm267_vm1, %v255_v4  ;;  %v519_v2 = vld [vmem:[%s850_s5 + $0x1] sm:$0x1] }
  0x12   : > { %687 = vmatprep.mubr.msk.bf16.mxu0 %vm729_vm0, %v728_v1 }
  0x13   : > { %668 = vmatpush3.bf16.msra.mxu1 %v705_v15 }
  0x14   : > { %669 = vmatprep.subr.bf16.mxu1 %v728_v1 }
  0x17   : > { %670 = vmatpush3.bf16.msra.mxu1 %v706_v16 }
  0x18   : > { %671 = vmatprep.subr.bf16.mxu1 %v728_v1 }
  0x1b   : > { %672 = vmatpush3.bf16.msra.mxu1 %v707_v17 }
  0x1c   : > { %673 = vmatprep.subr.bf16.mxu1 %v728_v1 }
  0x1f   : > { %674 = vmatpush3.bf16.msra.mxu1 %v708_v18 }
  0x20   : > { %675 = vmatprep.subr.bf16.mxu1 %v728_v1 }
  0x23   : > { %676 = vmatpush3.bf16.msra.mxu1 %v709_v19 }
  0x24   : > { %677 = vmatprep.subr.bf16.mxu1 %v728_v1 }
  0x27   : > { %678 = vmatpush3.bf16.msra.mxu1 %v710_v20 }
  0x28   : > { %679 = vmatprep.subr.bf16.mxu1 %v728_v1 }
  0x2b   : > { %680 = vmatpush3.bf16.msra.mxu1 %v711_v21 }
  0xd1   : > { %v305_v6 = vpop.f32.mrf.mxu0 }
  0xd2   : > { %v306_v7 = vadd.f32 %v627_v5, %v305_v6 }
  0xd3   : > { %v663_v8 = vpop.f32.mrf.mxu0 }
  0xd4   : > { %312 = vadd.xlane.f32.xlu0 %v306_v7  ;;  %v316_v9 = vmul.f32 %v306_v7, %v306_v7 }
  0xd5   : > { %v308_v10 = vpop.f32.mrf.mxu0 }
  0xd6   : > { %v309_v11 = vadd.f32 %v627_v5, %v308_v10  ;;  %318 = vadd.xlane.f32.xlu1 %v316_v9 }
  0xd7   : > { %v664_v12 = vpop.f32.mrf.mxu0 }
  0xd8   : > { %314 = vadd.xlane.f32.xlu0 %v309_v11  ;;  %v317_v13 = vmul.f32 %v309_v11, %v309_v11 }
  0xda   : > { %320 = vadd.xlane.f32.xlu1 %v317_v13 }
 0x15d   : > { %v313_v22 = vpop.xlane.xlu0 %312 }
 0x15e   : > { %v322_v23 = vmul.f32 0.0078125, %v313_v22  ;;  %v641_v22 = vld [vmem:[%s849_s4 + $0x1] ss:$0 sm:$0xff] }
 0x15f   : > { %v319_v24 = vpop.xlane.xlu1 %318 }
 0x160   : > { %v326_v25 = vmul.f32 %v322_v23, %v322_v23  ;;  %v324_v26 = vmul.f32 0.0078125, %v319_v24  ;;  %v332_v38 = vsub.f32 %v306_v7, %v322_v23 }
 0x161   : > { %v315_v27 = vpop.xlane.xlu0 %314 }
 0x162   : > { %v328_v28 = vsub.f32 %v324_v26, %v326_v25  ;;  %v323_v29 = vmul.f32 0.0078125, %v315_v27  ;;  %v642_v27 = vld [vmem:[%s849_s4 + $0x2] ss:$0 sm:$0xff] }
 0x163   : > { %v321_v30 = vpop.xlane.xlu1 %320 }
 0x164   : > { %v330_v31 = vmax.f32 %v328_v28, 0.0  ;;  %v327_v32 = vmul.f32 %v323_v29, %v323_v29  ;;  %v325_v33 = vmul.f32 0.0078125, %v321_v30  ;;  %v333_v42 = vsub.f32 %v309_v11, %v323_v29 }
 0x166   : > { %v334_v34 = vadd.f32 1e-05, %v330_v31  ;;  %v329_v35 = vsub.f32 %v325_v33, %v327_v32 }
 0x168   : > { %712 = vrsqrt.f32 %v334_v34  ;;  %v331_v36 = vmax.f32 %v329_v35, 0.0 }
 0x16a   : > { %v335_v37 = vadd.f32 1e-05, %v331_v36  ;;  %v516_v36 = vld [vmem:[%s850_s5] sm:$0x1] }
 0x16c   : > { %714 = vrsqrt.f32 %v335_v37  ;;  %v517_v37 = vpack.c.bf16 %v516_v36, %v516_v36 }
 0x175   : > { %v713_v39 = vpop.eup %712 }
 0x176   : > { %v338_v41 = vmul.f32 %v713_v39, %v332_v38 }
 0x178   : > { %v345_v43 = vmul.f32 %v630_v40, %v338_v41 }
 0x179   : > { %v715_v44 = vpop.eup %714 }
 0x17a   : > { %v339_v46 = vmul.f32 %v715_v44, %v333_v42  ;;  %v352_v48 = vadd.f32 %v631_v45, %v345_v43 }
 0x17c   : > { %v346_v47 = vmul.f32 %v630_v40, %v339_v46  ;;  %v354_v50 = vmax.f32 %v352_v48, 0.0 }
 0x17e   : > { %v353_v49 = vadd.f32 %v631_v45, %v346_v47 }
 0x180   : > { %v355_v51 = vmax.f32 %v353_v49, 0.0 }
 0x182   : > { %v372_v52 = vpack.c.bf16 %v355_v51, %v354_v50 }
 0x184   : > { %682 = vmatmul.mubr.bf16.vlgmr.msra.gmra.mxu1 %v372_v52 }
 0x244   : > { %v460_v54 = vpop.f32.mrf.mxu1 }
 0x245   : > { %v461_v55 = vadd.f32 %v632_v53, %v460_v54 }
 0x246   : > { %v683_v56 = vpop.f32.mrf.mxu1 }
 0x247   : > { %v468_v57 = vsel %vm467_vm2, %v461_v55, 0.0  ;;  %v474_v58 = vmul.f32 %v461_v55, %v461_v55 }
 0x248   : > { %469 = vadd.xlane.f32.xlu0 %v468_v57  ;;  %v463_v59 = vpop.f32.mrf.mxu1 }
 0x249   : > { %v464_v60 = vadd.f32 %v632_v53, %v463_v59  ;;  %v476_v62 = vsel %vm467_vm2, %v474_v58, 0.0 }
 0x24a   : > { %v684_v61 = vpop.f32.mrf.mxu1 }
 0x24b   : > { %v471_v63 = vsel %vm467_vm2, %v464_v60, 0.0  ;;  %v475_v0 = vmul.f32 %v464_v60, %v464_v60 }
 0x24c   : > { %477 = vadd.xlane.f32.xlu0 %v476_v62  ;;  %472 = vadd.xlane.f32.xlu1 %v471_v63 }
 0x24d   : > { %v479_v1 = vsel %vm467_vm2, %v475_v0, 0.0 }
 0x250   : > { %480 = vadd.xlane.f32.xlu1 %v479_v1 }
 0x262   : > { %522 = vperm.xlu0 %702, %v519_v2  }
 0x2d1   : > { %v470_v4 = vpop.xlane.xlu0 %469 }
 0x2d2   : > { %v482_v5 = vmul.f32 0.015625, %v470_v4 }
 0x2d4   : > { %v486_v8 = vmul.f32 %v482_v5, %v482_v5  ;;  %v492_v20 = vsub.f32 %v461_v55, %v482_v5 }
 0x2d5   : > { %v478_v6 = vpop.xlane.xlu0 %477  ;;  %v473_v7 = vpop.xlane.xlu1 %472 }
 0x2d6   : > { %v484_v9 = vmul.f32 0.015625, %v478_v6  ;;  %v483_v10 = vmul.f32 0.015625, %v473_v7 }
 0x2d8   : > { %v488_v11 = vsub.f32 %v484_v9, %v486_v8  ;;  %v487_v14 = vmul.f32 %v483_v10, %v483_v10  ;;  %v493_v24 = vsub.f32 %v464_v60, %v483_v10 }
 0x2d9   : > { %v481_v12 = vpop.xlane.xlu1 %480 }
 0x2da   : > { %v490_v13 = vmax.f32 %v488_v11, 0.0  ;;  %v485_v15 = vmul.f32 0.015625, %v481_v12 }
 0x2dc   : > { %v494_v16 = vadd.f32 1e-05, %v490_v13  ;;  %v489_v17 = vsub.f32 %v485_v15, %v487_v14 }
 0x2dd   : > { %v523_v38 = vpop.permute.xlu0 %522 }
 0x2de   : > { %716 = vrsqrt.f32 %v494_v16  ;;  %v491_v18 = vmax.f32 %v489_v17, 0.0 }
 0x2e0   : > { %v495_v19 = vadd.f32 1e-05, %v491_v18 }
 0x2e2   : > { %718 = vrsqrt.f32 %v495_v19 }
 0x2eb   : > { %v717_v21 = vpop.eup %716 }
 0x2ec   : > { %v498_v23 = vmul.f32 %v717_v21, %v492_v20 }
 0x2ee   : > { %v505_v25 = vmul.f32 %v641_v22, %v498_v23 }
 0x2ef   : > { %v719_v26 = vpop.eup %718 }
 0x2f0   : > { %v499_v28 = vmul.f32 %v719_v26, %v493_v24  ;;  %v512_v30 = vadd.f32 %v642_v27, %v505_v25 }
 0x2f2   : > { %v506_v29 = vmul.f32 %v641_v22, %v499_v28  ;;  %v514_v32 = vmax.f32 %v512_v30, 0.0 }
 0x2f4   : > { %v513_v31 = vadd.f32 %v642_v27, %v506_v29 }
 0x2f6   : > { %v515_v33 = vmax.f32 %v513_v31, 0.0 }
 0x2f8   : > { %v518_v34 = vpack.c.bf16 %v515_v33, %v514_v32 }
 0x2fa   : > { %v529_v35 = vsel %vm467_vm2, %v518_v34, 0 }
 0x2fb   : > { %686 = vmatpush3.bf16.xpose.msra.mxu0 %v529_v35 }
 0x302   : > { %688 = vmatmul.mubr.msk.bf16.vlgmr.msra.gmra.mxu0 %vm467_vm2, %v517_v37 }
 0x3c2   : > { %v565_v39 = vpop.f32.mrf.mxu0 }
 0x3c3   : > { %v566_v40 = vadd.f32 %v565_v39, %v523_v38 }
 0x3c4   : > { %v689_v41 = vpop.f32.mrf.mxu0 }
 0x3c5   : > { %572 = vst.msk [vmem:[%s249_s18] sm:$0x1] %vm571_vm3, %v566_v40 }
 0x3c6   : > { %v568_v42 = vpop.f32.mrf.mxu0 }
 0x3c8   : > { %v690_v43 = vpop.f32.mrf.mxu0 }
 0x3c9 PF: > { %s16_s21 = sadd.s32 1, %s726_s21  }
 0x3ca   : > { %p13_p5 = scmp.ge.s32.totalorder %s16_s21, 6  }
 0x3cc   :  { %15 = sbr.rel (!%p13_p5) target bundleno = 1 (0x1), region = 74 }

</bundles_post_ra>
